<compile_context>
chip_gen: v6e
topology: v6e:2x2x1
jax: 0.10.0
libtpu: 0.0.40
codegen_flags: <defaults>
</compile_context>

<pallas_src>
import functools

import jax
import jax.numpy as jnp
from jax.experimental import pallas as pl
from jax.experimental.pallas import tpu as pltpu


def shallow_nn_kernel(x_ref, w1_ref, b1_ref, w2_ref, b2_ref, o_ref):
    """One batch tile: relu(x) -> x@W1+b1 -> relu -> @W2+b2."""
    # ReLU on the raw input (as in the PyTorch forward); feed the MXU with
    # bf16 operands, accumulate in f32. Works for f32 or bf16 x inputs.
    x = jnp.maximum(x_ref[...], 0.0).astype(jnp.bfloat16)
    h = jnp.dot(x, w1_ref[...], preferred_element_type=jnp.float32)
    h = jnp.maximum(h + b1_ref[...], 0.0).astype(jnp.bfloat16)
    y = jnp.dot(h, w2_ref[...], preferred_element_type=jnp.float32) + b2_ref[...]
    o_ref[...] = y.astype(o_ref.dtype)


def _round_up(n, m):
    return ((n + m - 1) // m) * m


def prepare_params(w1, b1, w2, b2):
    """One-time setup outside the hot path.

    PyTorch (out, in) weights -> (in, out) bf16, f32 row biases, and D_out
    lane-padded to a 128-multiple so the kernel's output stores are full-width
    (unmasked) vst. Returns the original d_out for optional slicing.
    """
    d_out = w2.shape[0]
    d_out_p = _round_up(d_out, 128)

    w1_io = jnp.transpose(w1).astype(jnp.bfloat16)   # (D_in, H)
    w2_io = jnp.transpose(w2).astype(jnp.bfloat16)   # (H, D_out)
    b1_row = b1.reshape(1, -1).astype(jnp.float32)   # (1, H)
    b2_row = b2.reshape(1, -1).astype(jnp.float32)   # (1, D_out)

    if d_out_p != d_out:
        w2_io = jnp.pad(w2_io, ((0, 0), (0, d_out_p - d_out)))
        b2_row = jnp.pad(b2_row, ((0, 0), (0, d_out_p - d_out)))

    return w1_io, b1_row, w2_io, b2_row, d_out


def _choose_block_b(B):
    """Pick a batch tile: big (HBM roofline + fills 256-wide MXU on v6e/v7x),
    but keep >=2 grid steps when the batch allows so the "parallel" axis can
    feed both v7x TensorCores."""
    if B <= 256:
        return _round_up(B, 8)            # single step over the whole batch
    bb = min(512, B // 2)                 # >=2 steps, cap at 512 rows
    return max(128, (bb // 128) * 128)    # keep 128-row / MXU alignment


@functools.partial(jax.jit, static_argnames=("block_b", "d_out", "out_dtype"))
def custom_network_forward(x, w1_io, b1_row, w2_io, b2_row, *,
                           block_b=None, d_out=None, out_dtype=jnp.float32):
    """x: (B, D_in) f32 (or bf16); weights already prepared by prepare_params.

    Returns (B, d_out) in out_dtype (f32 by default, matching the PyTorch
    module; pass jnp.bfloat16 to halve the output writeback on this
    memory-bound op).
    """
    B, d_in = x.shape
    H = w1_io.shape[1]
    d_out_p = w2_io.shape[1]              # already lane-padded in prepare_params
    if d_out is None:
        d_out = d_out_p

    if block_b is None:
        block_b = _choose_block_b(B)

    # Pad batch to a multiple of the tile only if needed (sliced off below).
    B_p = _round_up(B, block_b)
    if B_p != B:
        x = jnp.pad(x, ((0, B_p - B), (0, 0)))
    n_bt = B_p // block_b

    # Constant-index weight/bias blocks: single-buffered (no point
    # double-buffering data that never changes across the grid).
    resident = pl.Buffered(1)

    out = pl.pallas_call(
        shallow_nn_kernel,
        out_shape=jax.ShapeDtypeStruct((B_p, d_out_p), out_dtype),
        grid=(n_bt,),
        in_specs=[
            pl.BlockSpec((block_b, d_in), lambda i: (i, 0)),        # x tile
            pl.BlockSpec((d_in, H), lambda i: (0, 0),
                         pipeline_mode=resident),                   # W1 resident
            pl.BlockSpec((1, H), lambda i: (0, 0),
                         pipeline_mode=resident),                   # b1 resident
            pl.BlockSpec((H, d_out_p), lambda i: (0, 0),
                         pipeline_mode=resident),                   # W2 resident
            pl.BlockSpec((1, d_out_p), lambda i: (0, 0),
                         pipeline_mode=resident),                   # b2 resident
        ],
        out_specs=pl.BlockSpec((block_b, d_out_p), lambda i: (i, 0)),
        compiler_params=pltpu.CompilerParams(
            dimension_semantics=("parallel",),     # batch axis shards across TCs
            vmem_limit_bytes=48 * 1024 * 1024,     # headroom under v7x's 64 MiB
        ),
        # TODO(synk): if D_in/H scale so resident W1/W2 no longer fit VMEM, add a
        # K-reduction grid axis with an f32 accumulator + pl.when init/finalize.
    )(x, w1_io, b1_row, w2_io, b2_row)

    # Only slice when padding was actually applied (avoids an extra HBM copy).
    if B_p != B or d_out_p != d_out:
        out = out[:B, :d_out]
    return out


if __name__ == "__main__":
    # Aligned shapes: batch 512 -> two 256-row parallel tiles (both v7x TCs busy,
    # 256-row LHS fills the 256-wide MXU on v6e/v7x); 128-multiple feature dims.
    B, D_IN, HID, D_OUT = 512, 128, 256, 128

    key = jax.random.PRNGKey(0)
    k_x, k_w1, k_b1, k_w2, k_b2 = jax.random.split(key, 5)

    x = jax.random.normal(k_x, (B, D_IN), dtype=jnp.float32)
    # PyTorch nn.Linear parameter convention: weight (out, in), bias (out,).
    w1 = jax.random.normal(k_w1, (HID, D_IN), dtype=jnp.float32) * 0.1
    b1 = jax.random.normal(k_b1, (HID,), dtype=jnp.float32) * 0.1
    w2 = jax.random.normal(k_w2, (D_OUT, HID), dtype=jnp.float32) * 0.1
    b2 = jax.random.normal(k_b2, (D_OUT,), dtype=jnp.float32) * 0.1

    # One-time parameter prep (transpose + bf16 cast + lane padding).
    w1_io, b1_row, w2_io, b2_row, d_out = prepare_params(w1, b1, w2, b2)

    out = custom_network_forward(x, w1_io, b1_row, w2_io, b2_row, d_out=d_out)
    out = jax.block_until_ready(out)

    # Pure-JAX reference using the same bf16-operand / f32-accumulate math.
    xr = jnp.maximum(x, 0.0).astype(jnp.bfloat16)
    h_ref = jnp.dot(xr, w1_io, preferred_element_type=jnp.float32) + b1_row
    h_ref = jnp.maximum(h_ref, 0.0).astype(jnp.bfloat16)
    ref = (jnp.dot(h_ref, w2_io, preferred_element_type=jnp.float32) + b2_row)[:, :D_OUT]

    assert out.shape == (B, D_OUT)
    assert jnp.allclose(out, ref, atol=1e-2, rtol=1e-2), float(
        jnp.max(jnp.abs(out - ref))
    )

    print("KERNEL_OK")
</pallas_src>

<mosaic_0001>
module attributes {stable_mosaic.version = 11 : i64} {
  func.func @shallow_nn_kernel(%arg0: i32, %arg1: memref<256x128xf32, #tpu.memory_space<vmem>>, %arg2: memref<128x256xbf16, #tpu.memory_space<vmem>>, %arg3: memref<1x256xf32, #tpu.memory_space<vmem>>, %arg4: memref<256x128xbf16, #tpu.memory_space<vmem>>, %arg5: memref<1x128xf32, #tpu.memory_space<vmem>>, %arg6: memref<256x128xf32, #tpu.memory_space<vmem>>) attributes {dimension_semantics = [#tpu.dimension_semantics<parallel>], iteration_bounds = array<i64: 2>, scalar_prefetch = 0 : i64, scratch_operands = 0 : i64, tpu.core_type = #tpu.core_type<tc>, window_params = [{transform_indices = @transform_0, window_bounds = array<i64: 256, 128>}, {pipeline_mode = #tpu.pipeline_mode<synchronous>, transform_indices = @transform_1, window_bounds = array<i64: 128, 256>}, {pipeline_mode = #tpu.pipeline_mode<synchronous>, transform_indices = @transform_2, window_bounds = array<i64: 1, 256>}, {pipeline_mode = #tpu.pipeline_mode<synchronous>, transform_indices = @transform_3, window_bounds = array<i64: 256, 128>}, {pipeline_mode = #tpu.pipeline_mode<synchronous>, transform_indices = @transform_4, window_bounds = array<i64: 1, 128>}, {transform_indices = @transform_5, window_bounds = array<i64: 256, 128>}]} {
    %c0 = arith.constant 0 : index
    %c0_0 = arith.constant 0 : index
    %0 = vector.load %arg1[%c0, %c0_0] : memref<256x128xf32, #tpu.memory_space<vmem>>, vector<256x128xf32>
    %cst = arith.constant 0.000000e+00 : f32
    %1 = vector.broadcast %cst : f32 to vector<256x128xf32>
    %2 = arith.maximumf %0, %1 : vector<256x128xf32>
    %3 = arith.truncf %2 : vector<256x128xf32> to vector<256x128xbf16>
    %c0_1 = arith.constant 0 : index
    %c0_2 = arith.constant 0 : index
    %4 = vector.load %arg2[%c0_1, %c0_2] : memref<128x256xbf16, #tpu.memory_space<vmem>>, vector<128x256xbf16>
    %cst_3 = arith.constant dense<0.000000e+00> : vector<256x256xf32>
    %5 = tpu.matmul %3, %4, %cst_3 {dimension_numbers = #tpu.dot_dimension_numbers<[1], [0], [0], [1], [0, 0, 1, 1], [], []>} : vector<256x128xbf16>, vector<128x256xbf16>, vector<256x256xf32> -> vector<256x256xf32>
    %c0_4 = arith.constant 0 : index
    %c0_5 = arith.constant 0 : index
    %6 = vector.load %arg3[%c0_4, %c0_5] : memref<1x256xf32, #tpu.memory_space<vmem>>, vector<1x256xf32>
    %7 = vector.broadcast %6 : vector<1x256xf32> to vector<256x256xf32>
    %8 = arith.addf %5, %7 : vector<256x256xf32>
    %cst_6 = arith.constant 0.000000e+00 : f32
    %9 = vector.broadcast %cst_6 : f32 to vector<256x256xf32>
    %10 = arith.maximumf %8, %9 : vector<256x256xf32>
    %11 = arith.truncf %10 : vector<256x256xf32> to vector<256x256xbf16>
    %c0_7 = arith.constant 0 : index
    %c0_8 = arith.constant 0 : index
    %12 = vector.load %arg4[%c0_7, %c0_8] : memref<256x128xbf16, #tpu.memory_space<vmem>>, vector<256x128xbf16>
    %cst_9 = arith.constant dense<0.000000e+00> : vector<256x128xf32>
    %13 = tpu.matmul %11, %12, %cst_9 {dimension_numbers = #tpu.dot_dimension_numbers<[1], [0], [0], [1], [0, 0, 1, 1], [], []>} : vector<256x256xbf16>, vector<256x128xbf16>, vector<256x128xf32> -> vector<256x128xf32>
    %c0_10 = arith.constant 0 : index
    %c0_11 = arith.constant 0 : index
    %14 = vector.load %arg5[%c0_10, %c0_11] : memref<1x128xf32, #tpu.memory_space<vmem>>, vector<1x128xf32>
    %15 = vector.broadcast %14 : vector<1x128xf32> to vector<256x128xf32>
    %16 = arith.addf %13, %15 : vector<256x128xf32>
    %c0_12 = arith.constant 0 : index
    %c0_13 = arith.constant 0 : index
    %17 = vector.load %arg6[%c0_12, %c0_13] : memref<256x128xf32, #tpu.memory_space<vmem>>, vector<256x128xf32>
    tpu.vector_store %arg6[%c0_12, %c0_13], %16 {strides = array<i32>} : memref<256x128xf32, #tpu.memory_space<vmem>>, vector<256x128xf32>,
    return
  }
  func.func @transform_0(%arg0: i32) -> (i32, i32) {
    %c0_i32 = arith.constant 0 : i32
    %c0_i32_0 = arith.constant 0 : i32
    return %arg0, %c0_i32 : i32, i32
  }
  func.func @transform_1(%arg0: i32) -> (i32, i32) {
    %c0_i32 = arith.constant 0 : i32
    %c0_i32_0 = arith.constant 0 : i32
    %c0_i32_1 = arith.constant 0 : i32
    return %c0_i32, %c0_i32_0 : i32, i32
  }
  func.func @transform_2(%arg0: i32) -> (i32, i32) {
    %c0_i32 = arith.constant 0 : i32
    %c0_i32_0 = arith.constant 0 : i32
    %c0_i32_1 = arith.constant 0 : i32
    return %c0_i32, %c0_i32_0 : i32, i32
  }
  func.func @transform_3(%arg0: i32) -> (i32, i32) {
    %c0_i32 = arith.constant 0 : i32
    %c0_i32_0 = arith.constant 0 : i32
    %c0_i32_1 = arith.constant 0 : i32
    return %c0_i32, %c0_i32_0 : i32, i32
  }
  func.func @transform_4(%arg0: i32) -> (i32, i32) {
    %c0_i32 = arith.constant 0 : i32
    %c0_i32_0 = arith.constant 0 : i32
    %c0_i32_1 = arith.constant 0 : i32
    return %c0_i32, %c0_i32_0 : i32, i32
  }
  func.func @transform_5(%arg0: i32) -> (i32, i32) {
    %c0_i32 = arith.constant 0 : i32
    %c0_i32_0 = arith.constant 0 : i32
    return %arg0, %c0_i32 : i32, i32
  }
}

</mosaic_0001>

<bundles_post_ra>
// kernel: custom_network_forward.1
= control target key start
LH: loop header
LB: loop body
LE: loop exit
PB: predicated region body
PF: predicated region fallthrough
CT: control target
= control target key end

     0   :  { %10 = vsyncpa [#allocation3], 0  ;;  %s2047_s0 = inlined_call_operand.hbm [shape: f32[512,128], index: 0, kind: input, shape index: {}]   ;;  %s2048_s1 = inlined_call_operand.hbm [shape: bf16[128,256], index: 1, kind: input, shape index: {}]   ;;  %s2049_s2 = inlined_call_operand.vmem [shape: f32[1,256], index: 2, kind: input, shape index: {}]   ;;  %s2050_s3 = inlined_call_operand.hbm [shape: bf16[256,128], index: 3, kind: input, shape index: {}]   ;;  %s2051_s4 = inlined_call_operand.vmem [shape: f32[1,128], index: 4, kind: input, shape index: {}]   ;;  %s2052_s5 = inlined_call_operand.hbm [shape: f32[512,128], index: 5, kind: output, shape index: {}]  }
   0x1   :  { %12 = vsyncpa [#allocation3 + $0x1], 0 }
   0x2   :  { %13 = vsyncpa [#allocation6], 0 }
   0x3   :  { %14 = vsyncpa [#allocation4], 0 }
   0x4   :  { %16 = vsyncpa [#allocation4 + $0x1], 0  ;;  %s1656_s18 = smov 0   ;;  %s1658_s19 = smov 0  }
   0x5   :  { %s1660_s20 = smov 0   ;;  %s1662_s21 = smov 0  }
   0x6 LB: > { %s1677_s22 = sadd.s32 4294967295, %s1613_s21   ;;  %s1186_s23 = sadd.s32 4294967294, %s1613_s21   ;;  %s1613_s21 = sphi %s1662_s21, %s2075_s21   ;;  %s1609_s20 = sphi %s1660_s20, %s2074_s20   ;;  %s1605_s19 = sphi %s1658_s19, %s2073_s19   ;;  %s1601_s18 = sphi %s1656_s18, %s2072_s18  }
   0x7   : > { %p42_p0 = scmp.ne.s32.totalorder %s1605_s19, %s1601_s18  ;;  %p2053_p1 = scmp.eq.s32.totalorder %s1677_s22, 0 }
   0x8   : > { %p150_p2 = scmp.eq.s32.totalorder %s1677_s22, 1  ;;  %p156_p3 = scmp.eq.s32.totalorder %s1186_s23, 1 }
   0x9   : > { %p1686_p4 = por %p2053_p1, %p42_p0  ;;  %p1187_p5 = scmp.ge.s32.totalorder %s1613_s21, 1 }
   0xa   : > { %p1691_p6 = por %p156_p3, %p42_p0  ;;  %p163_p7 = scmp.lt.s32.totalorder %s1613_s21, 3 }
   0xb   : > { %s2058_s24 = scalar_select %p1686_p4, 1, 0 }
   0xc   : > { %s2059_s25 = scalar_select %p1691_p6, 1, 0 }
   0xd   : > { %p1696_p8 = pnand %p1187_p5, %p163_p7  ;;  %s1615_s27 = smov [#allocation5]  }
   0xe   : > { %s175_s28 = sshll.u32 %s1615_s27, 4  ;;  %s1616_s30 = smov [#allocation7]   ;;  %s176_s28 = int_to_ptr.vmem [resolvable:$true] %s175_s28 }
   0xf   : > { %s2060_s26 = scalar_select %p1696_p8, 1, 0 }
  0x10   : > { %p1363_p9 = pneg %p1696_p8  ;;  %s191_s6 = sshll.u32 %s1616_s30, 4  ;;  %s192_s6 = int_to_ptr.vmem [resolvable:$true] %s191_s6 }
  0x11   : > { %s1476_s7 = scalar_lea.vmem %s176_s28, 2048  ;;  %p1484_p5 = scmp.lt.s32.totalorder %s176_s28, %s176_s28 }
  0x12   : > { %p1705_p11 = pnand %p1363_p9, %p2053_p1  ;;  %p1477_p13 = scmp.ne.s32.totalorder %s176_s28, %s1476_s7 }
  0x13   : > { %p1485_p7 = scmp.lt.s32.totalorder %s1476_s7, %s1476_s7 }
  0x14   : > { %p1467_p12 = pneg %p1705_p11 }
  0x15   : > { %p1486_p10 = por %p1485_p7, %p1484_p5 }
  0x16   : > { %p1479_p0 = pnand %p1477_p13, %p1467_p12 }
  0x18   : > { %p1480_p3 = pneg %p1479_p0 }
  0x1a   : > { %p1487_p9 = pnand %p1486_p10, %p1480_p3 }
  0x1c   : > { %1490 = shalt.err (!%p1487_p9)
}
  0x1d   : > { %s2054_s8 = smov 128   ;;  %s1618_s9 = smov 8  }
  0x1e   : > { %1366 = dma.hbm_to_vmem [thread:$0]  (!%p1705_p11), %s2048_s1, 2048, %s176_s28, [#allocation6], %s2054_s8, %s2054_s8, %s1618_s9  }
  0x1f   : > { %s1502_s12 = scalar_lea.vmem %s192_s6, 2048  ;;  %p1510_p10 = scmp.lt.s32.totalorder %s192_s6, %s192_s6 }
  0x20   : > { %p1503_p13 = scmp.ne.s32.totalorder %s192_s6, %s1502_s12  ;;  %p1511_p3 = scmp.lt.s32.totalorder %s1502_s12, %s1502_s12 }
  0x22   : > { %p1505_p0 = pnand %p1503_p13, %p1467_p12  ;;  %p1512_p7 = por %p1511_p3, %p1510_p10 }
  0x24   : > { %p1506_p5 = pneg %p1505_p0 }
  0x26   : > { %p1513_p9 = pnand %p1512_p7, %p1506_p5 }
  0x28   : > { %1516 = shalt.err (!%p1513_p9)
}
  0x29   : > { %s1619_s13 = smov 64   ;;  %s1620_s14 = smov 4  }
  0x2a   : > { %1369 = dma.hbm_to_vmem [thread:$0]  (!%p1705_p11), %s2050_s3, 2048, %s192_s6, [#allocation6], %s1619_s13, %s1619_s13, %s1620_s14  }
  0x2b   : > { %s1731_s17 = sadd.s32 1, %s1613_s21   ;;  %s29_s27 = sadd.s32 1, %s1609_s20 }
  0x2c   : > { %s26_s23 = ssub.s32 %s1613_s21, %s1731_s17  ;;  %p36_p13 = scmp.ne.s32.totalorder %s1609_s20, %s1605_s19 }
  0x2d   : > { %p27_p12 = scmp.eq.s32.totalorder %s26_s23, 0  ;;  %p37_p0 = scmp.eq.s32.totalorder %s1613_s21, 0 }
  0x2e   : > { %p1744_p10 = por %p150_p2, %p36_p13  ;;  %p1380_p3 = scmp.lt.s32.totalorder %s1613_s21, 2 }
  0x2f   : > { %s1740_s28 = scalar_select %p27_p12, %s1609_s20, %s29_s27  }
  0x30   : > { %p38_p5 = por %p37_p0, %p36_p13  ;;  %s208_s29 = sand.u32 1, %s1609_s20  }
  0x31   : > { %s2062_s30 = scalar_select %p1744_p10, 1, 0 }
  0x32   : > { %s1191_s7 = sshll.u32 %s208_s29, 8  ;;  %s1237_s6 = sshll.u32 %s1613_s21, 12 }
  0x33   : > { %s1754_s12 = scalar_lea.hbm %s2047_s0, %s1237_s6  ;;  %s212_s13 = scalar_lea.vmem [#allocation2], %s1191_s7 }
  0x34   : > { %s219_s14 = sshll.u32 %s212_s13, 4  ;;  %p1758_p2 = pnand %p1380_p3, %p38_p5  ;;  %s1756_s14 = int_to_ptr.vmem [resolvable:$true] %s219_s14 }
  0x35   : > { %s1762_s16 = scalar_lea.sflag [#allocation3], %s208_s29  ;;  %s1517_s23 = scalar_lea.hbm %s1754_s12, 4096 }
  0x36   : > { %p1518_p11 = scmp.ne.s32.totalorder %s1754_s12, %s1517_s23  ;;  %p1519_p7 = pneg %p1758_p2 }
  0x37   : > { %s1522_s7 = scalar_lea.hbm %s2047_s0, 8192  ;;  %p1523_p13 = scmp.lt.s32.totalorder %s1754_s12, %s2047_s0 }
  0x38   : > { %p1520_p9 = pnand %p1519_p7, %p1518_p11  ;;  %p1524_p0 = scmp.lt.s32.totalorder %s1522_s7, %s1517_s23 }
  0x3a   : > { %p1521_p12 = pneg %p1520_p9  ;;  %p1525_p5 = por %p1524_p0, %p1523_p13 }
  0x3c   : > { %p1526_p3 = pnand %p1525_p5, %p1521_p12 }
  0x3e   : > { %1529 = shalt.err (!%p1526_p3)
}
  0x3f   : > { %s1530_s29 = scalar_lea.vmem %s1756_s14, 4096  ;;  %s1621_s13 = smov [#allocation2]  }
  0x40   : > { %p1531_p1 = scmp.ne.s32.totalorder %s1756_s14, %s1530_s29  ;;  %s1535_s8 = sshll.u32 %s1621_s13, 4  ;;  %s1536_s8 = int_to_ptr.vmem [resolvable:$false] %s1535_s8 }
  0x41   : > { %s1537_s27 = scalar_lea.vmem %s1536_s8, 8192  ;;  %p1538_p9 = scmp.lt.s32.totalorder %s1756_s14, %s1536_s8 }
  0x42   : > { %p1533_p6 = pnand %p1531_p1, %p1519_p7  ;;  %p1539_p10 = scmp.lt.s32.totalorder %s1537_s27, %s1530_s29 }
  0x44   : > { %p1534_p11 = pneg %p1533_p6  ;;  %p1540_p4 = por %p1539_p10, %p1538_p9 }
  0x46   : > { %p1541_p8 = pnand %p1540_p4, %p1534_p11 }
  0x48   : > { %1544 = shalt.err (!%p1541_p8)
}
  0x49   : > { %s2064_s23 = smov 128   ;;  %p2065_p1 = scmp.ne.s32.totalorder %s2060_s26, 0 }
  0x4a   : > { %1373 = dma.hbm_to_vmem [thread:$0]  (!%p1758_p2), %s1754_s12, 4096, %s1756_s14, %s1762_s16, %s2064_s23, %s2064_s23, %s1618_s9  }
  0x4b   : > { %231 = sbr.rel (%p2065_p1) target bundleno = 660 (0x294), region = 40  ;;  %s1789_s6 = sand.u32 (!%p2065_p1), 1, %s1605_s19  }
  0x4c   : > { %s1195_s8 = sshll.u32 (!%p2065_p1), %s1789_s6, 8  ;;  %s234_s7 = scalar_lea.sflag (!%p2065_p1), [#allocation3], %s1789_s6 }
  0x4d   : > { %s1795_s15 = scalar_lea.vmem (!%p2065_p1), [#allocation2], %s1195_s8  ;;  %p2066_p4 = scmp.ne.s32.totalorder (!%p2065_p1), %s2058_s24, 0 }
  0x50   : > { %1588 = dma.done.wait (%p2066_p4), %s234_s7, 4096  }
  0x51   : > { %1590 = vsyncadd (%p2066_p4), %s234_s7, 4294963200  ;;  %p2067_p6 = scmp.eq.s32.totalorder %s1677_s22, 0 }
  0x53   : > { %1592 = dma.done.wait (%p2067_p6), [#allocation6], 4096   ;;  %p2068_p8 = pmov %p2067_p6 }
  0x54   : > { %v1622_v0 = vmov 0   ;;  %v1425_v1 = vld [vmem:[#allocation5 + $0x74] ss:$8 sps:$4 sm:$0xff]   ;;  %v1427_v2 = vld [vmem:[#allocation5 + $0x70] ss:$8 sps:$4 sm:$0xff]   ;;  %v275_v16 = vld [vmem:[%s1795_s15] sm:$0xff] }
  0x55   : > { %1594 = vsyncadd (%p2068_p8), [#allocation6], 4294963200  ;;  %495 = vmatprep.mubr.bf16.mxu0 %v1622_v0  ;;  %463 = vmatprep.subr.bf16.mxu0 %v1425_v1  ;;  %v1428_v3 = vld [vmem:[#allocation5 + $0x64] ss:$8 sps:$4 sm:$0xff]   ;;  %v1430_v4 = vld [vmem:[#allocation5 + $0x60] ss:$8 sps:$4 sm:$0xff]  }
  0x56   : > { %464 = vmatpush1.bf16.msra.mxu0 %v1427_v2  ;;  %v1431_v5 = vld [vmem:[#allocation5 + $0x54] ss:$8 sps:$4 sm:$0xff]   ;;  %v1433_v6 = vld [vmem:[#allocation5 + $0x50] ss:$8 sps:$4 sm:$0xff]   ;;  %v1434_v7 = vld [vmem:[#allocation5 + $0x44] ss:$8 sps:$4 sm:$0xff]  }
  0x57   : > { %465 = vmatprep.subr.bf16.mxu0 %v1428_v3  ;;  %v1436_v8 = vld [vmem:[#allocation5 + $0x40] ss:$8 sps:$4 sm:$0xff]   ;;  %v1437_v9 = vld [vmem:[#allocation5 + $0x34] ss:$8 sps:$4 sm:$0xff]   ;;  %v1439_v10 = vld [vmem:[#allocation5 + $0x30] ss:$8 sps:$4 sm:$0xff]  }
  0x58   : > { %v1440_v11 = vld [vmem:[#allocation5 + $0x24] ss:$8 sps:$4 sm:$0xff]   ;;  %v1442_v12 = vld [vmem:[#allocation5 + $0x20] ss:$8 sps:$4 sm:$0xff]   ;;  %v1443_v13 = vld [vmem:[#allocation5 + $0x14] ss:$8 sps:$4 sm:$0xff]  }
  0x59   : > { %v1445_v14 = vld [vmem:[#allocation5 + $0x10] ss:$8 sps:$4 sm:$0xff]   ;;  %v1446_v15 = vld [vmem:[#allocation5 + $0x4] ss:$8 sps:$4 sm:$0xff]   ;;  %v307_v18 = vmax.f32 %v275_v16, 0.0  ;;  %s1932_s14 = scalar_lea.vmem [#allocation8], %s1195_s8 }
  0x5a   : > { %466 = vmatpush1.bf16.msra.mxu0 %v1430_v4  ;;  %v276_v17 = vld [vmem:[%s1795_s15 + $0x8] sm:$0xff]  ;;  %v1449_v20 = vld [vmem:[#allocation7 + $0x78] sm:$0xff]   ;;  %v1451_v22 = vld [vmem:[#allocation7 + $0x70] sm:$0xff]   ;;  %s1238_s16 = sshll.u32 %s1677_s22, 12  ;;  %s1094_s10 = sshll.u32 %s1932_s14, 4  ;;  %s2002_s10 = int_to_ptr.vmem [resolvable:$true] %s1094_s10 }
  0x5b   : > { %467 = vmatprep.subr.bf16.mxu0 %v1431_v5  ;;  %v308_v19 = vmax.f32 %v276_v17, 0.0  ;;  %v1450_v21 = vld [vmem:[#allocation7 + $0x38] sm:$0xff]   ;;  %v1448_v23 = vld [vmem:[#allocation5] ss:$8 sps:$4 sm:$0xff]   ;;  %v277_v24 = vld [vmem:[%s1795_s15 + $0x10] sm:$0xff]  ;;  %1239 = vmatprep.subr.bf16.mxu1 %v1449_v20  ;;  %s2000_s13 = scalar_lea.hbm %s2052_s5, %s1238_s16  ;;  %s1081_s27 = scalar_lea.sflag [#allocation4], %s1789_s6 }
  0x5c   : > { %v278_v25 = vld [vmem:[%s1795_s15 + $0x18] sm:$0xff]  ;;  %1240 = vmatpush3.bf16.msra.mxu1 %v1450_v21  ;;  %v1452_v26 = vld [vmem:[#allocation7 + $0x30] sm:$0xff]   ;;  %v1453_v28 = vld [vmem:[#allocation7 + $0x68] sm:$0xff]   ;;  %v309_v29 = vmax.f32 %v277_v24, 0.0  ;;  %s1545_s23 = scalar_lea.vmem %s2002_s10, 4096  ;;  %p2069_p2 = scmp.ne.s32.totalorder %s2062_s30, 0 }
  0x5d   : > { %v339_v27 = vpack.c.bf16 %v308_v19, %v307_v18  ;;  %1241 = vmatprep.subr.bf16.mxu1 %v1451_v22  ;;  %v310_v30 = vmax.f32 %v278_v25, 0.0  ;;  %v1454_v31 = vld [vmem:[#allocation7 + $0x28] sm:$0xff]   ;;  %v1455_v32 = vld [vmem:[#allocation7 + $0x60] sm:$0xff]   ;;  %v1457_v35 = vld [vmem:[#allocation7 + $0x58] sm:$0xff]   ;;  %p1546_p10 = scmp.ne.s32.totalorder %s2002_s10, %s1545_s23  ;;  %s1623_s22 = smov [#allocation8]  }
  0x5e   : > { %468 = vmatpush1.bf16.msra.mxu0 %v1433_v6  ;;  %v1456_v33 = vld [vmem:[#allocation7 + $0x20] sm:$0xff]   ;;  %v280_v37 = vld [vmem:[%s1795_s15 + $0x28] sm:$0xff]  ;;  %v1458_v38 = vld [vmem:[#allocation7 + $0x18] sm:$0xff]   ;;  %s1549_s8 = sshll.u32 %s1623_s22, 4  ;;  %s1550_s8 = int_to_ptr.vmem [resolvable:$false] %s1549_s8 }
  0x5f   : > { %469 = vmatprep.subr.bf16.mxu0 %v1434_v7  ;;  %v340_v34 = vpack.c.bf16 %v310_v30, %v309_v29  ;;  %v279_v36 = vld [vmem:[%s1795_s15 + $0x20] sm:$0xff]  ;;  %v312_v40 = vmax.f32 %v280_v37, 0.0  ;;  %v281_v42 = vld [vmem:[%s1795_s15 + $0x30] sm:$0xff]  ;;  %v282_v43 = vld [vmem:[%s1795_s15 + $0x38] sm:$0xff]  ;;  %p1547_p7 = pnand %p1546_p10, %p2069_p2  ;;  %s1551_s7 = scalar_lea.vmem %s1550_s8, 8192 }
  0x60   : > { %1242 = vmatpush3.bf16.msra.mxu1 %v1452_v26  ;;  %v311_v39 = vmax.f32 %v279_v36, 0.0  ;;  %v313_v44 = vmax.f32 %v281_v42, 0.0  ;;  %v314_v45 = vmax.f32 %v282_v43, 0.0  ;;  %v283_v47 = vld [vmem:[%s1795_s15 + $0x40] sm:$0xff]  ;;  %v284_v48 = vld [vmem:[%s1795_s15 + $0x48] sm:$0xff]  ;;  %v285_v52 = vld [vmem:[%s1795_s15 + $0x50] sm:$0xff]  ;;  %p1552_p13 = scmp.lt.s32.totalorder %s2002_s10, %s1550_s8  ;;  %p1553_p0 = scmp.lt.s32.totalorder %s1551_s7, %s1545_s23 }
  0x61   : > { %1243 = vmatprep.subr.bf16.mxu1 %v1453_v28  ;;  %v315_v49 = vmax.f32 %v283_v47, 0.0  ;;  %v316_v50 = vmax.f32 %v284_v48, 0.0  ;;  %v286_v53 = vld [vmem:[%s1795_s15 + $0x58] sm:$0xff]  ;;  %v317_v54 = vmax.f32 %v285_v52, 0.0  ;;  %v287_v57 = vld [vmem:[%s1795_s15 + $0x60] sm:$0xff]  ;;  %v288_v58 = vld [vmem:[%s1795_s15 + $0x68] sm:$0xff]  ;;  %p1548_p12 = pneg %p1547_p7 }
  0x62   : > { %470 = vmatpush1.bf16.msra.mxu0 %v1436_v8  ;;  %v341_v41 = vpack.c.bf16 %v312_v40, %v311_v39  ;;  %v342_v46 = vpack.c.bf16 %v314_v45, %v313_v44  ;;  %v318_v55 = vmax.f32 %v286_v53, 0.0  ;;  %v319_v59 = vmax.f32 %v287_v57, 0.0  ;;  %v289_v62 = vld [vmem:[%s1795_s15 + $0x70] sm:$0xff]  ;;  %v290_v63 = vld [vmem:[%s1795_s15 + $0x78] sm:$0xff]  ;;  %v291_v4 = vld [vmem:[%s1795_s15 + $0x80] sm:$0xff]  ;;  %p1554_p5 = por %p1553_p0, %p1552_p13 }
  0x63   : > { %471 = vmatprep.subr.bf16.mxu0 %v1437_v9  ;;  %v343_v51 = vpack.c.bf16 %v316_v50, %v315_v49  ;;  %v320_v60 = vmax.f32 %v288_v58, 0.0  ;;  %v321_v1 = vmax.f32 %v289_v62, 0.0  ;;  %v322_v2 = vmax.f32 %v290_v63, 0.0  ;;  %v292_v5 = vld [vmem:[%s1795_s15 + $0x88] sm:$0xff]  ;;  %v293_v9 = vld [vmem:[%s1795_s15 + $0x90] sm:$0xff]  ;;  %v295_v17 = vld [vmem:[%s1795_s15 + $0xa0] sm:$0xff] }
  0x64   : > { %1244 = vmatpush3.bf16.msra.mxu1 %v1454_v31  ;;  %v344_v56 = vpack.c.bf16 %v318_v55, %v317_v54  ;;  %v323_v6 = vmax.f32 %v291_v4, 0.0  ;;  %v324_v7 = vmax.f32 %v292_v5, 0.0  ;;  %v1461_v16 = vld [vmem:[#allocation7 + $0x48] sm:$0xff]   ;;  %v327_v20 = vmax.f32 %v295_v17, 0.0  ;;  %v1463_v22 = vld [vmem:[#allocation7 + $0x40] sm:$0xff]   ;;  %v297_v25 = vld [vmem:[%s1795_s15 + $0xb0] sm:$0xff]  ;;  %p1555_p3 = pnand %p1554_p5, %p1548_p12 }
  0x65   : > { %1245 = vmatprep.subr.bf16.mxu1 %v1455_v32  ;;  %v345_v61 = vpack.c.bf16 %v320_v60, %v319_v59  ;;  %v346_v3 = vpack.c.bf16 %v322_v2, %v321_v1  ;;  %v296_v18 = vld [vmem:[%s1795_s15 + $0xa8] sm:$0xff]  ;;  %v298_v26 = vld [vmem:[%s1795_s15 + $0xb8] sm:$0xff]  ;;  %v299_v30 = vld [vmem:[%s1795_s15 + $0xc0] sm:$0xff]  ;;  %v373_v50 = vlaneseq }
  0x66   : > { %472 = vmatpush1.bf16.msra.mxu0 %v1439_v10  ;;  %v347_v8 = vpack.c.bf16 %v324_v7, %v323_v6  ;;  %v294_v10 = vld [vmem:[%s1795_s15 + $0x98] sm:$0xff]  ;;  %v1462_v19 = vld [vmem:[#allocation7 + $0x8] sm:$0xff]   ;;  %v328_v21 = vmax.f32 %v296_v18, 0.0  ;;  %v330_v28 = vmax.f32 %v298_v26, 0.0  ;;  %v331_v32 = vmax.f32 %v299_v30, 0.0  ;;  %v303_v40 = vld [vmem:[%s1795_s15 + $0xe0] sm:$0xff] }
  0x67   : > { %473 = vmatprep.subr.bf16.mxu0 %v1440_v11  ;;  %v325_v11 = vmax.f32 %v293_v9, 0.0  ;;  %v300_v31 = vld [vmem:[%s1795_s15 + $0xc8] sm:$0xff]  ;;  %v302_v36 = vld [vmem:[%s1795_s15 + $0xd8] sm:$0xff]  ;;  %v335_v42 = vmax.f32 %v303_v40, 0.0  ;;  %v305_v45 = vld [vmem:[%s1795_s15 + $0xf0] sm:$0xff] }
  0x68   : > { %1246 = vmatpush3.bf16.msra.mxu1 %v1456_v33  ;;  %v349_v24 = vpack.c.bf16 %v328_v21, %v327_v20  ;;  %v332_v33 = vmax.f32 %v300_v31, 0.0  ;;  %v337_v47 = vmax.f32 %v305_v45, 0.0  ;;  %v371_v54 = vld [vmem:[%s2049_s2] sm:$0x3] }
  0x69   : > { %1247 = vmatprep.subr.bf16.mxu1 %v1457_v35  ;;  %v301_v35 = vld [vmem:[%s1795_s15 + $0xd0] sm:$0xff] }
  0x6a   : > { %474 = vmatpush1.bf16.msra.mxu0 %v1442_v12  ;;  %v326_v12 = vmax.f32 %v294_v10, 0.0  ;;  %v333_v37 = vmax.f32 %v301_v35, 0.0 }
  0x6b   : > { %475 = vmatprep.subr.bf16.mxu0 %v1443_v13  ;;  %v1459_v13 = vld [vmem:[#allocation7 + $0x50] sm:$0xff]  }
  0x6c   : > { %1248 = vmatpush3.bf16.msra.mxu1 %v1458_v38  ;;  %v334_v38 = vmax.f32 %v302_v36, 0.0 }
  0x6d   : > { %1249 = vmatprep.subr.bf16.mxu1 %v1459_v13 }
  0x6e   : > { %476 = vmatpush1.bf16.msra.mxu0 %v1445_v14  ;;  %v1460_v14 = vld [vmem:[#allocation7 + $0x10] sm:$0xff]   ;;  %v352_v39 = vpack.c.bf16 %v334_v38, %v333_v37 }
  0x6f   : > { %477 = vmatprep.subr.bf16.mxu0 %v1446_v15  ;;  %v348_v15 = vpack.c.bf16 %v326_v12, %v325_v11 }
  0x70   : > { %1250 = vmatpush3.bf16.msra.mxu1 %v1460_v14 }
  0x71   : > { %1251 = vmatprep.subr.bf16.mxu1 %v1461_v16 }
  0x72   : > { %478 = vmatpush1.bf16.msra.mxu0 %v1448_v23  ;;  %v1464_v23 = vld [vmem:[#allocation7] sm:$0xff]  }
  0x74   : > { %1252 = vmatpush3.bf16.msra.mxu1 %v1462_v19 }
  0x75   : > { %496 = vmatmul.mubr.bf16.vlgmr.msra.gmra.mxu0 %v339_v27  ;;  %1253 = vmatprep.subr.bf16.mxu1 %v1463_v22  ;;  %v329_v27 = vmax.f32 %v297_v25, 0.0 }
  0x76   : > { %505 = vmatprep.mubr.bf16.mxu0 %v1622_v0 }
  0x77   : > { %v350_v29 = vpack.c.bf16 %v330_v28, %v329_v27 }
  0x78   : > { %1254 = vmatpush3.bf16.msra.mxu1 %v1464_v23 }
  0x7d   : > { %506 = vmatmul.mubr.bf16.gmra.mxu0 %v340_v34  ;;  %v351_v34 = vpack.c.bf16 %v332_v33, %v331_v32 }
  0x7e   : > { %515 = vmatprep.mubr.bf16.mxu0 %v1622_v0 }
  0x85   : > { %516 = vmatmul.mubr.bf16.gmra.mxu0 %v341_v41  ;;  %v304_v41 = vld [vmem:[%s1795_s15 + $0xe8] sm:$0xff] }
  0x86   : > { %525 = vmatprep.mubr.bf16.mxu0 %v1622_v0  ;;  %v336_v43 = vmax.f32 %v304_v41, 0.0 }
  0x88   : > { %v353_v44 = vpack.c.bf16 %v336_v43, %v335_v42 }
  0x8d   : > { %526 = vmatmul.mubr.bf16.gmra.mxu0 %v342_v46  ;;  %v306_v46 = vld [vmem:[%s1795_s15 + $0xf8] sm:$0xff] }
  0x8e   : > { %535 = vmatprep.mubr.bf16.mxu0 %v1622_v0  ;;  %v338_v48 = vmax.f32 %v306_v46, 0.0 }
  0x90   : > { %v354_v49 = vpack.c.bf16 %v338_v48, %v337_v47 }
  0x95   : > { %536 = vmatmul.mubr.bf16.gmra.mxu0 %v343_v51  ;;  %v374_v51 = vshrl.u32 %v373_v50, 7 }
  0x96   : > { %545 = vmatprep.mubr.bf16.mxu0 %v1622_v0 }
  0x97   : > { %v379_v52 = vsub.s32 1, %v374_v51  ;;  %v375_v53 = vsub.s32 0, %v374_v51 }
  0x99   : > { %v1858_v57 = vrot.slane %v371_v54, %v375_v53 }
  0x9d   : > { %546 = vmatmul.mubr.bf16.gmra.mxu0 %v344_v56  ;;  %v1856_v56 = vrot.slane %v371_v54, %v379_v52 }
  0x9e   : > { %555 = vmatprep.mubr.bf16.mxu0 %v1622_v0 }
  0xa5   : > { %556 = vmatmul.mubr.bf16.gmra.mxu0 %v345_v61 }
  0xa6   : > { %565 = vmatprep.mubr.bf16.mxu0 %v1622_v0 }
  0xad   : > { %566 = vmatmul.mubr.bf16.gmra.mxu0 %v346_v3 }
  0xae   : > { %575 = vmatprep.mubr.bf16.mxu0 %v1622_v0 }
  0xb5   : > { %576 = vmatmul.mubr.bf16.gmra.mxu0 %v347_v8 }
  0xb6   : > { %585 = vmatprep.mubr.bf16.mxu0 %v1622_v0 }
  0xbd   : > { %586 = vmatmul.mubr.bf16.gmra.mxu0 %v348_v15 }
  0xbe   : > { %595 = vmatprep.mubr.bf16.mxu0 %v1622_v0 }
  0xc5   : > { %596 = vmatmul.mubr.bf16.gmra.mxu0 %v349_v24 }
  0xc6   : > { %605 = vmatprep.mubr.bf16.mxu0 %v1622_v0 }
  0xcd   : > { %606 = vmatmul.mubr.bf16.gmra.mxu0 %v350_v29 }
  0xce   : > { %615 = vmatprep.mubr.bf16.mxu0 %v1622_v0 }
  0xd5   : > { %616 = vmatmul.mubr.bf16.gmra.mxu0 %v351_v34 }
  0xd6   : > { %625 = vmatprep.mubr.bf16.mxu0 %v1622_v0 }
  0xdd   : > { %626 = vmatmul.mubr.bf16.gmra.mxu0 %v352_v39 }
  0xde   : > { %635 = vmatprep.mubr.bf16.mxu0 %v1622_v0 }
  0xe5   : > { %636 = vmatmul.mubr.bf16.gmra.mxu0 %v353_v44 }
  0xe6   : > { %645 = vmatprep.mubr.bf16.mxu0 %v1622_v0 }
  0xed   : > { %646 = vmatmul.mubr.bf16.gmra.mxu0 %v354_v49 }
 0x135   : > { %v497_v55 = vpop.f32.mrf.mxu0 }
 0x136   : > { %v498_v61 = vadd.f32 %v497_v55, %v1858_v57 }
 0x137   : > { %v499_v58 = vpop.f32.mrf.mxu0 }
 0x138   : > { %v500_v60 = vadd.f32 %v499_v58, %v1856_v56  ;;  %v656_v5 = vmax.f32 %v498_v61, 0.0 }
 0x139   : > { %v501_v59 = vpop.f32.mrf.mxu0 }
 0x13a   : > { %v502_v0 = vadd.f32 %v501_v59, %v1858_v57  ;;  %v657_v3 = vmax.f32 %v500_v60, 0.0 }
 0x13b   : > { %v503_v62 = vpop.f32.mrf.mxu0 }
 0x13c   : > { %v504_v63 = vadd.f32 %v503_v62, %v1856_v56  ;;  %v658_v1 = vmax.f32 %v502_v0, 0.0 }
 0x13d   : > { %v507_v2 = vpop.f32.mrf.mxu0 }
 0x13e   : > { %v659_v4 = vmax.f32 %v504_v63, 0.0  ;;  %v720_v8 = vpack.c.bf16 %v658_v1, %v656_v5  ;;  %v508_v12 = vadd.f32 %v507_v2, %v1858_v57 }
 0x13f   : > { %v509_v6 = vpop.f32.mrf.mxu0 }
 0x140   : > { %v721_v7 = vpack.c.bf16 %v659_v4, %v657_v3  ;;  %v510_v10 = vadd.f32 %v509_v6, %v1856_v56  ;;  %v660_v19 = vmax.f32 %v508_v12, 0.0 }
 0x141   : > { %v511_v9 = vpop.f32.mrf.mxu0 }
 0x142   : > { %v512_v11 = vadd.f32 %v511_v9, %v1858_v57  ;;  %919 = vmatprep.mubr.bf16.mxu1 %v721_v7  ;;  %v661_v17 = vmax.f32 %v510_v10, 0.0 }
 0x143   : > { %v513_v13 = vpop.f32.mrf.mxu0  ;;  %920 = vmatmul.mubr.bf16.vlgmr.msra.gmra.mxu1 %v720_v8 }
 0x144   : > { %v514_v14 = vadd.f32 %v513_v13, %v1856_v56  ;;  %v662_v15 = vmax.f32 %v512_v11, 0.0 }
 0x145   : > { %v517_v16 = vpop.f32.mrf.mxu0 }
 0x146   : > { %v663_v18 = vmax.f32 %v514_v14, 0.0  ;;  %v722_v22 = vpack.c.bf16 %v662_v15, %v660_v19  ;;  %v518_v26 = vadd.f32 %v517_v16, %v1858_v57 }
 0x147   : > { %v519_v20 = vpop.f32.mrf.mxu0 }
 0x148   : > { %v723_v21 = vpack.c.bf16 %v663_v18, %v661_v17  ;;  %v520_v24 = vadd.f32 %v519_v20, %v1856_v56  ;;  %v664_v33 = vmax.f32 %v518_v26, 0.0 }
 0x149   : > { %v521_v23 = vpop.f32.mrf.mxu0 }
 0x14a   : > { %v522_v25 = vadd.f32 %v521_v23, %v1858_v57  ;;  %927 = vmatprep.mubr.bf16.mxu1 %v723_v21  ;;  %v665_v31 = vmax.f32 %v520_v24, 0.0 }
 0x14b   : > { %v523_v27 = vpop.f32.mrf.mxu0  ;;  %928 = vmatmul.mubr.bf16.gmra.mxu1 %v722_v22 }
 0x14c   : > { %v524_v28 = vadd.f32 %v523_v27, %v1856_v56  ;;  %v666_v29 = vmax.f32 %v522_v25, 0.0 }
 0x14d   : > { %v527_v30 = vpop.f32.mrf.mxu0 }
 0x14e   : > { %v667_v32 = vmax.f32 %v524_v28, 0.0  ;;  %v724_v36 = vpack.c.bf16 %v666_v29, %v664_v33  ;;  %v528_v40 = vadd.f32 %v527_v30, %v1858_v57 }
 0x14f   : > { %v529_v34 = vpop.f32.mrf.mxu0 }
 0x150   : > { %v725_v35 = vpack.c.bf16 %v667_v32, %v665_v31  ;;  %v530_v38 = vadd.f32 %v529_v34, %v1856_v56  ;;  %v668_v47 = vmax.f32 %v528_v40, 0.0 }
 0x151   : > { %v531_v37 = vpop.f32.mrf.mxu0 }
 0x152   : > { %v532_v39 = vadd.f32 %v531_v37, %v1858_v57  ;;  %935 = vmatprep.mubr.bf16.mxu1 %v725_v35  ;;  %v669_v45 = vmax.f32 %v530_v38, 0.0 }
 0x153   : > { %v533_v41 = vpop.f32.mrf.mxu0  ;;  %936 = vmatmul.mubr.bf16.gmra.mxu1 %v724_v36 }
 0x154   : > { %v534_v42 = vadd.f32 %v533_v41, %v1856_v56  ;;  %v670_v43 = vmax.f32 %v532_v39, 0.0 }
 0x155   : > { %v537_v44 = vpop.f32.mrf.mxu0 }
 0x156   : > { %v671_v46 = vmax.f32 %v534_v42, 0.0  ;;  %v726_v50 = vpack.c.bf16 %v670_v43, %v668_v47  ;;  %v538_v54 = vadd.f32 %v537_v44, %v1858_v57 }
 0x157   : > { %v539_v48 = vpop.f32.mrf.mxu0 }
 0x158   : > { %v727_v49 = vpack.c.bf16 %v671_v46, %v669_v45  ;;  %v540_v52 = vadd.f32 %v539_v48, %v1856_v56  ;;  %v672_v62 = vmax.f32 %v538_v54, 0.0 }
 0x159   : > { %v541_v51 = vpop.f32.mrf.mxu0 }
 0x15a   : > { %v542_v53 = vadd.f32 %v541_v51, %v1858_v57  ;;  %943 = vmatprep.mubr.bf16.mxu1 %v727_v49  ;;  %v673_v0 = vmax.f32 %v540_v52, 0.0 }
 0x15b   : > { %v543_v55 = vpop.f32.mrf.mxu0  ;;  %944 = vmatmul.mubr.bf16.gmra.mxu1 %v726_v50 }
 0x15c   : > { %v544_v58 = vadd.f32 %v543_v55, %v1856_v56  ;;  %v674_v59 = vmax.f32 %v542_v53, 0.0 }
 0x15d   : > { %v547_v60 = vpop.f32.mrf.mxu0 }
 0x15e   : > { %v675_v61 = vmax.f32 %v544_v58, 0.0  ;;  %v728_v2 = vpack.c.bf16 %v674_v59, %v672_v62  ;;  %v548_v6 = vadd.f32 %v547_v60, %v1858_v57 }
 0x15f   : > { %v549_v63 = vpop.f32.mrf.mxu0 }
 0x160   : > { %v729_v1 = vpack.c.bf16 %v675_v61, %v673_v0  ;;  %v550_v4 = vadd.f32 %v549_v63, %v1856_v56  ;;  %v676_v13 = vmax.f32 %v548_v6, 0.0 }
 0x161   : > { %v551_v3 = vpop.f32.mrf.mxu0 }
 0x162   : > { %v552_v5 = vadd.f32 %v551_v3, %v1858_v57  ;;  %951 = vmatprep.mubr.bf16.mxu1 %v729_v1  ;;  %v677_v11 = vmax.f32 %v550_v4, 0.0 }
 0x163   : > { %v553_v7 = vpop.f32.mrf.mxu0  ;;  %952 = vmatmul.mubr.bf16.gmra.mxu1 %v728_v2 }
 0x164   : > { %v554_v8 = vadd.f32 %v553_v7, %v1856_v56  ;;  %v678_v9 = vmax.f32 %v552_v5, 0.0 }
 0x165   : > { %v557_v10 = vpop.f32.mrf.mxu0 }
 0x166   : > { %v679_v12 = vmax.f32 %v554_v8, 0.0  ;;  %v730_v16 = vpack.c.bf16 %v678_v9, %v676_v13  ;;  %v558_v20 = vadd.f32 %v557_v10, %v1858_v57 }
 0x167   : > { %v559_v14 = vpop.f32.mrf.mxu0 }
 0x168   : > { %v731_v15 = vpack.c.bf16 %v679_v12, %v677_v11  ;;  %v560_v18 = vadd.f32 %v559_v14, %v1856_v56  ;;  %v680_v27 = vmax.f32 %v558_v20, 0.0 }
 0x169   : > { %v561_v17 = vpop.f32.mrf.mxu0 }
 0x16a   : > { %v562_v19 = vadd.f32 %v561_v17, %v1858_v57  ;;  %959 = vmatprep.mubr.bf16.mxu1 %v731_v15  ;;  %v681_v25 = vmax.f32 %v560_v18, 0.0 }
 0x16b   : > { %v563_v21 = vpop.f32.mrf.mxu0  ;;  %960 = vmatmul.mubr.bf16.gmra.mxu1 %v730_v16 }
 0x16c   : > { %v564_v22 = vadd.f32 %v563_v21, %v1856_v56  ;;  %v682_v23 = vmax.f32 %v562_v19, 0.0 }
 0x16d   : > { %v567_v24 = vpop.f32.mrf.mxu0 }
 0x16e   : > { %v683_v26 = vmax.f32 %v564_v22, 0.0  ;;  %v732_v30 = vpack.c.bf16 %v682_v23, %v680_v27  ;;  %v568_v34 = vadd.f32 %v567_v24, %v1858_v57 }
 0x16f   : > { %v569_v28 = vpop.f32.mrf.mxu0 }
 0x170   : > { %v733_v29 = vpack.c.bf16 %v683_v26, %v681_v25  ;;  %v570_v32 = vadd.f32 %v569_v28, %v1856_v56  ;;  %v684_v41 = vmax.f32 %v568_v34, 0.0 }
 0x171   : > { %v571_v31 = vpop.f32.mrf.mxu0 }
 0x172   : > { %v572_v33 = vadd.f32 %v571_v31, %v1858_v57  ;;  %967 = vmatprep.mubr.bf16.mxu1 %v733_v29  ;;  %v685_v39 = vmax.f32 %v570_v32, 0.0 }
 0x173   : > { %v573_v35 = vpop.f32.mrf.mxu0  ;;  %968 = vmatmul.mubr.bf16.gmra.mxu1 %v732_v30 }
 0x174   : > { %v574_v36 = vadd.f32 %v573_v35, %v1856_v56  ;;  %v686_v37 = vmax.f32 %v572_v33, 0.0 }
 0x175   : > { %v577_v38 = vpop.f32.mrf.mxu0 }
 0x176   : > { %v687_v40 = vmax.f32 %v574_v36, 0.0  ;;  %v734_v44 = vpack.c.bf16 %v686_v37, %v684_v41  ;;  %v578_v48 = vadd.f32 %v577_v38, %v1858_v57 }
 0x177   : > { %v579_v42 = vpop.f32.mrf.mxu0 }
 0x178   : > { %v735_v43 = vpack.c.bf16 %v687_v40, %v685_v39  ;;  %v580_v46 = vadd.f32 %v579_v42, %v1856_v56  ;;  %v688_v55 = vmax.f32 %v578_v48, 0.0 }
 0x179   : > { %v581_v45 = vpop.f32.mrf.mxu0 }
 0x17a   : > { %v582_v47 = vadd.f32 %v581_v45, %v1858_v57  ;;  %975 = vmatprep.mubr.bf16.mxu1 %v735_v43  ;;  %v689_v53 = vmax.f32 %v580_v46, 0.0 }
 0x17b   : > { %v583_v49 = vpop.f32.mrf.mxu0  ;;  %976 = vmatmul.mubr.bf16.gmra.mxu1 %v734_v44 }
 0x17c   : > { %v584_v50 = vadd.f32 %v583_v49, %v1856_v56  ;;  %v690_v51 = vmax.f32 %v582_v47, 0.0 }
 0x17d   : > { %v587_v52 = vpop.f32.mrf.mxu0 }
 0x17e   : > { %v691_v54 = vmax.f32 %v584_v50, 0.0  ;;  %v736_v60 = vpack.c.bf16 %v690_v51, %v688_v55  ;;  %v588_v63 = vadd.f32 %v587_v52, %v1858_v57 }
 0x17f   : > { %v589_v58 = vpop.f32.mrf.mxu0 }
 0x180   : > { %v737_v59 = vpack.c.bf16 %v691_v54, %v689_v53  ;;  %v590_v61 = vadd.f32 %v589_v58, %v1856_v56  ;;  %v692_v7 = vmax.f32 %v588_v63, 0.0 }
 0x181   : > { %v591_v0 = vpop.f32.mrf.mxu0 }
 0x182   : > { %v592_v62 = vadd.f32 %v591_v0, %v1858_v57  ;;  %983 = vmatprep.mubr.bf16.mxu1 %v737_v59  ;;  %v693_v5 = vmax.f32 %v590_v61, 0.0 }
 0x183   : > { %v593_v1 = vpop.f32.mrf.mxu0  ;;  %984 = vmatmul.mubr.bf16.gmra.mxu1 %v736_v60 }
 0x184   : > { %v594_v2 = vadd.f32 %v593_v1, %v1856_v56  ;;  %v694_v3 = vmax.f32 %v592_v62, 0.0 }
 0x185   : > { %v597_v4 = vpop.f32.mrf.mxu0 }
 0x186   : > { %v695_v6 = vmax.f32 %v594_v2, 0.0  ;;  %v738_v10 = vpack.c.bf16 %v694_v3, %v692_v7  ;;  %v598_v14 = vadd.f32 %v597_v4, %v1858_v57 }
 0x187   : > { %v599_v8 = vpop.f32.mrf.mxu0 }
 0x188   : > { %v739_v9 = vpack.c.bf16 %v695_v6, %v693_v5  ;;  %v600_v12 = vadd.f32 %v599_v8, %v1856_v56  ;;  %v696_v21 = vmax.f32 %v598_v14, 0.0 }
 0x189   : > { %v601_v11 = vpop.f32.mrf.mxu0 }
 0x18a   : > { %v602_v13 = vadd.f32 %v601_v11, %v1858_v57  ;;  %991 = vmatprep.mubr.bf16.mxu1 %v739_v9  ;;  %v697_v19 = vmax.f32 %v600_v12, 0.0 }
 0x18b   : > { %v603_v15 = vpop.f32.mrf.mxu0  ;;  %992 = vmatmul.mubr.bf16.gmra.mxu1 %v738_v10 }
 0x18c   : > { %v604_v16 = vadd.f32 %v603_v15, %v1856_v56  ;;  %v698_v17 = vmax.f32 %v602_v13, 0.0 }
 0x18d   : > { %v607_v18 = vpop.f32.mrf.mxu0 }
 0x18e   : > { %v699_v20 = vmax.f32 %v604_v16, 0.0  ;;  %v740_v24 = vpack.c.bf16 %v698_v17, %v696_v21  ;;  %v608_v28 = vadd.f32 %v607_v18, %v1858_v57 }
 0x18f   : > { %v609_v22 = vpop.f32.mrf.mxu0 }
 0x190   : > { %v741_v23 = vpack.c.bf16 %v699_v20, %v697_v19  ;;  %v610_v26 = vadd.f32 %v609_v22, %v1856_v56  ;;  %v700_v35 = vmax.f32 %v608_v28, 0.0 }
 0x191   : > { %v611_v25 = vpop.f32.mrf.mxu0 }
 0x192   : > { %v612_v27 = vadd.f32 %v611_v25, %v1858_v57  ;;  %999 = vmatprep.mubr.bf16.mxu1 %v741_v23  ;;  %v701_v33 = vmax.f32 %v610_v26, 0.0 }
 0x193   : > { %v613_v29 = vpop.f32.mrf.mxu0  ;;  %1000 = vmatmul.mubr.bf16.gmra.mxu1 %v740_v24 }
 0x194   : > { %v614_v30 = vadd.f32 %v613_v29, %v1856_v56  ;;  %v702_v31 = vmax.f32 %v612_v27, 0.0 }
 0x195   : > { %v617_v32 = vpop.f32.mrf.mxu0 }
 0x196   : > { %v703_v34 = vmax.f32 %v614_v30, 0.0  ;;  %v742_v38 = vpack.c.bf16 %v702_v31, %v700_v35  ;;  %v618_v42 = vadd.f32 %v617_v32, %v1858_v57  ;;  %v1927_v32 = vld [vmem:[%s2051_s4] ss:$0 sm:$0xff] }
 0x197   : > { %v619_v36 = vpop.f32.mrf.mxu0 }
 0x198   : > { %v743_v37 = vpack.c.bf16 %v703_v34, %v701_v33  ;;  %v620_v40 = vadd.f32 %v619_v36, %v1856_v56  ;;  %v704_v49 = vmax.f32 %v618_v42, 0.0 }
 0x199   : > { %v621_v39 = vpop.f32.mrf.mxu0 }
 0x19a   : > { %v622_v41 = vadd.f32 %v621_v39, %v1858_v57  ;;  %1007 = vmatprep.mubr.bf16.mxu1 %v743_v37  ;;  %v705_v47 = vmax.f32 %v620_v40, 0.0 }
 0x19b   : > { %v623_v43 = vpop.f32.mrf.mxu0  ;;  %1008 = vmatmul.mubr.bf16.gmra.mxu1 %v742_v38 }
 0x19c   : > { %v624_v44 = vadd.f32 %v623_v43, %v1856_v56  ;;  %v706_v45 = vmax.f32 %v622_v41, 0.0 }
 0x19d   : > { %v627_v46 = vpop.f32.mrf.mxu0 }
 0x19e   : > { %v707_v48 = vmax.f32 %v624_v44, 0.0  ;;  %v744_v52 = vpack.c.bf16 %v706_v45, %v704_v49  ;;  %v628_v58 = vadd.f32 %v627_v46, %v1858_v57 }
 0x19f   : > { %v629_v50 = vpop.f32.mrf.mxu0 }
 0x1a0   : > { %v745_v51 = vpack.c.bf16 %v707_v48, %v705_v47  ;;  %v630_v54 = vadd.f32 %v629_v50, %v1856_v56  ;;  %v708_v1 = vmax.f32 %v628_v58, 0.0 }
 0x1a1   : > { %v631_v53 = vpop.f32.mrf.mxu0 }
 0x1a2   : > { %v632_v55 = vadd.f32 %v631_v53, %v1858_v57  ;;  %1015 = vmatprep.mubr.bf16.mxu1 %v745_v51  ;;  %v709_v62 = vmax.f32 %v630_v54, 0.0 }
 0x1a3   : > { %v633_v59 = vpop.f32.mrf.mxu0  ;;  %1016 = vmatmul.mubr.bf16.gmra.mxu1 %v744_v52 }
 0x1a4   : > { %v634_v60 = vadd.f32 %v633_v59, %v1856_v56  ;;  %v710_v0 = vmax.f32 %v632_v55, 0.0 }
 0x1a5   : > { %v637_v61 = vpop.f32.mrf.mxu0 }
 0x1a6   : > { %v711_v63 = vmax.f32 %v634_v60, 0.0  ;;  %v746_v4 = vpack.c.bf16 %v710_v0, %v708_v1  ;;  %v638_v8 = vadd.f32 %v637_v61, %v1858_v57 }
 0x1a7   : > { %v639_v2 = vpop.f32.mrf.mxu0 }
 0x1a8   : > { %v747_v3 = vpack.c.bf16 %v711_v63, %v709_v62  ;;  %v640_v6 = vadd.f32 %v639_v2, %v1856_v56  ;;  %v712_v15 = vmax.f32 %v638_v8, 0.0 }
 0x1a9   : > { %v641_v5 = vpop.f32.mrf.mxu0 }
 0x1aa   : > { %v642_v7 = vadd.f32 %v641_v5, %v1858_v57  ;;  %1023 = vmatprep.mubr.bf16.mxu1 %v747_v3  ;;  %v713_v13 = vmax.f32 %v640_v6, 0.0 }
 0x1ab   : > { %v643_v9 = vpop.f32.mrf.mxu0  ;;  %1024 = vmatmul.mubr.bf16.gmra.mxu1 %v746_v4 }
 0x1ac   : > { %v644_v10 = vadd.f32 %v643_v9, %v1856_v56  ;;  %v714_v11 = vmax.f32 %v642_v7, 0.0 }
 0x1ad   : > { %v647_v12 = vpop.f32.mrf.mxu0 }
 0x1ae   : > { %v715_v14 = vmax.f32 %v644_v10, 0.0  ;;  %v748_v18 = vpack.c.bf16 %v714_v11, %v712_v15  ;;  %v648_v22 = vadd.f32 %v647_v12, %v1858_v57 }
 0x1af   : > { %v649_v16 = vpop.f32.mrf.mxu0 }
 0x1b0   : > { %v749_v17 = vpack.c.bf16 %v715_v14, %v713_v13  ;;  %v650_v20 = vadd.f32 %v649_v16, %v1856_v56  ;;  %v716_v28 = vmax.f32 %v648_v22, 0.0 }
 0x1b1   : > { %v651_v19 = vpop.f32.mrf.mxu0 }
 0x1b2   : > { %v652_v21 = vadd.f32 %v651_v19, %v1858_v57  ;;  %1031 = vmatprep.mubr.bf16.mxu1 %v749_v17  ;;  %v717_v26 = vmax.f32 %v650_v20, 0.0 }
 0x1b3   : > { %v653_v23 = vpop.f32.mrf.mxu0  ;;  %1032 = vmatmul.mubr.bf16.gmra.mxu1 %v748_v18 }
 0x1b4   : > { %v654_v24 = vadd.f32 %v653_v23, %v1856_v56  ;;  %v718_v25 = vmax.f32 %v652_v21, 0.0 }
 0x1b6   : > { %v719_v27 = vmax.f32 %v654_v24, 0.0  ;;  %v750_v30 = vpack.c.bf16 %v718_v25, %v716_v28 }
 0x1b8   : > { %v751_v29 = vpack.c.bf16 %v719_v27, %v717_v26 }
 0x1ba   : > { %1039 = vmatprep.mubr.bf16.mxu1 %v751_v29 }
 0x1bb   : > { %1040 = vmatmul.mubr.bf16.gmra.mxu1 %v750_v30 }
 0x203   : > { %v1255_v31 = vpop.f32.mrf.mxu1 }
 0x205   : > { %v1256_v57 = vpop.f32.mrf.mxu1 }
 0x206   : > { %v1257_v33 = vadd.f32 %v1256_v57, %v1255_v31 }
 0x207   : > { %v1258_v34 = vpop.f32.mrf.mxu1 }
 0x208   : > { %v922_v56 = vadd.f32 %v1257_v33, %v1927_v32 }
 0x209   : > { %v1259_v35 = vpop.f32.mrf.mxu1 }
 0x20a   : > { %1048 = vst [vmem:[%s1932_s14] sm:$0xff] %v922_v56  ;;  %v1260_v36 = vadd.f32 %v1259_v35, %v1258_v34 }
 0x20b   : > { %v1261_v37 = vpop.f32.mrf.mxu1 }
 0x20c   : > { %v925_v38 = vadd.f32 %v1260_v36, %v1927_v32 }
 0x20d   : > { %v1262_v39 = vpop.f32.mrf.mxu1 }
 0x20e   : > { %1049 = vst [vmem:[%s1932_s14 + $0x8] sm:$0xff] %v925_v38  ;;  %v1263_v40 = vadd.f32 %v1262_v39, %v1261_v37 }
 0x20f   : > { %v1264_v41 = vpop.f32.mrf.mxu1 }
 0x210   : > { %v930_v42 = vadd.f32 %v1263_v40, %v1927_v32 }
 0x211   : > { %v1265_v43 = vpop.f32.mrf.mxu1 }
 0x212   : > { %1050 = vst [vmem:[%s1932_s14 + $0x10] sm:$0xff] %v930_v42  ;;  %v1266_v44 = vadd.f32 %v1265_v43, %v1264_v41 }
 0x213   : > { %v1267_v45 = vpop.f32.mrf.mxu1 }
 0x214   : > { %v933_v46 = vadd.f32 %v1266_v44, %v1927_v32 }
 0x215   : > { %v1268_v47 = vpop.f32.mrf.mxu1 }
 0x216   : > { %1051 = vst [vmem:[%s1932_s14 + $0x18] sm:$0xff] %v933_v46  ;;  %v1269_v48 = vadd.f32 %v1268_v47, %v1267_v45 }
 0x217   : > { %v1270_v49 = vpop.f32.mrf.mxu1 }
 0x218   : > { %v938_v50 = vadd.f32 %v1269_v48, %v1927_v32 }
 0x219   : > { %v1271_v51 = vpop.f32.mrf.mxu1 }
 0x21a   : > { %1052 = vst [vmem:[%s1932_s14 + $0x20] sm:$0xff] %v938_v50  ;;  %v1272_v52 = vadd.f32 %v1271_v51, %v1270_v49 }
 0x21b   : > { %v1273_v53 = vpop.f32.mrf.mxu1 }
 0x21c   : > { %v941_v54 = vadd.f32 %v1272_v52, %v1927_v32 }
 0x21d   : > { %v1274_v55 = vpop.f32.mrf.mxu1 }
 0x21e   : > { %1053 = vst [vmem:[%s1932_s14 + $0x28] sm:$0xff] %v941_v54  ;;  %v1275_v58 = vadd.f32 %v1274_v55, %v1273_v53 }
 0x21f   : > { %v1276_v59 = vpop.f32.mrf.mxu1 }
 0x220   : > { %v946_v60 = vadd.f32 %v1275_v58, %v1927_v32 }
 0x221   : > { %v1277_v0 = vpop.f32.mrf.mxu1 }
 0x222   : > { %1054 = vst [vmem:[%s1932_s14 + $0x30] sm:$0xff] %v946_v60  ;;  %v1278_v61 = vadd.f32 %v1277_v0, %v1276_v59 }
 0x223   : > { %v1279_v62 = vpop.f32.mrf.mxu1 }
 0x224   : > { %v949_v63 = vadd.f32 %v1278_v61, %v1927_v32 }
 0x225   : > { %v1280_v1 = vpop.f32.mrf.mxu1 }
 0x226   : > { %1055 = vst [vmem:[%s1932_s14 + $0x38] sm:$0xff] %v949_v63  ;;  %v1281_v2 = vadd.f32 %v1280_v1, %v1279_v62 }
 0x227   : > { %v1282_v3 = vpop.f32.mrf.mxu1 }
 0x228   : > { %v954_v4 = vadd.f32 %v1281_v2, %v1927_v32 }
 0x229   : > { %v1283_v5 = vpop.f32.mrf.mxu1 }
 0x22a   : > { %1056 = vst [vmem:[%s1932_s14 + $0x40] sm:$0xff] %v954_v4  ;;  %v1284_v6 = vadd.f32 %v1283_v5, %v1282_v3 }
 0x22b   : > { %v1285_v7 = vpop.f32.mrf.mxu1 }
 0x22c   : > { %v957_v8 = vadd.f32 %v1284_v6, %v1927_v32 }
 0x22d   : > { %v1286_v9 = vpop.f32.mrf.mxu1 }
 0x22e   : > { %1057 = vst [vmem:[%s1932_s14 + $0x48] sm:$0xff] %v957_v8  ;;  %v1287_v10 = vadd.f32 %v1286_v9, %v1285_v7 }
 0x22f   : > { %v1288_v11 = vpop.f32.mrf.mxu1 }
 0x230   : > { %v962_v12 = vadd.f32 %v1287_v10, %v1927_v32 }
 0x231   : > { %v1289_v13 = vpop.f32.mrf.mxu1 }
 0x232   : > { %1058 = vst [vmem:[%s1932_s14 + $0x50] sm:$0xff] %v962_v12  ;;  %v1290_v14 = vadd.f32 %v1289_v13, %v1288_v11 }
 0x233   : > { %v1291_v15 = vpop.f32.mrf.mxu1 }
 0x234   : > { %v965_v16 = vadd.f32 %v1290_v14, %v1927_v32 }
 0x235   : > { %v1292_v17 = vpop.f32.mrf.mxu1 }
 0x236   : > { %1059 = vst [vmem:[%s1932_s14 + $0x58] sm:$0xff] %v965_v16  ;;  %v1293_v18 = vadd.f32 %v1292_v17, %v1291_v15 }
 0x237   : > { %v1294_v19 = vpop.f32.mrf.mxu1 }
 0x238   : > { %v970_v20 = vadd.f32 %v1293_v18, %v1927_v32 }
 0x239   : > { %v1295_v21 = vpop.f32.mrf.mxu1 }
 0x23a   : > { %1060 = vst [vmem:[%s1932_s14 + $0x60] sm:$0xff] %v970_v20  ;;  %v1296_v22 = vadd.f32 %v1295_v21, %v1294_v19 }
 0x23b   : > { %v1297_v23 = vpop.f32.mrf.mxu1 }
 0x23c   : > { %v973_v24 = vadd.f32 %v1296_v22, %v1927_v32 }
 0x23d   : > { %v1298_v25 = vpop.f32.mrf.mxu1 }
 0x23e   : > { %1061 = vst [vmem:[%s1932_s14 + $0x68] sm:$0xff] %v973_v24  ;;  %v1299_v26 = vadd.f32 %v1298_v25, %v1297_v23 }
 0x23f   : > { %v1300_v27 = vpop.f32.mrf.mxu1 }
 0x240   : > { %v978_v28 = vadd.f32 %v1299_v26, %v1927_v32 }
 0x241   : > { %v1301_v29 = vpop.f32.mrf.mxu1 }
 0x242   : > { %1062 = vst [vmem:[%s1932_s14 + $0x70] sm:$0xff] %v978_v28  ;;  %v1302_v30 = vadd.f32 %v1301_v29, %v1300_v27 }
 0x243   : > { %v1303_v31 = vpop.f32.mrf.mxu1 }
 0x244   : > { %v981_v57 = vadd.f32 %v1302_v30, %v1927_v32 }
 0x245   : > { %v1304_v33 = vpop.f32.mrf.mxu1 }
 0x246   : > { %1063 = vst [vmem:[%s1932_s14 + $0x78] sm:$0xff] %v981_v57  ;;  %v1305_v34 = vadd.f32 %v1304_v33, %v1303_v31 }
 0x247   : > { %v1306_v56 = vpop.f32.mrf.mxu1 }
 0x248   : > { %v986_v35 = vadd.f32 %v1305_v34, %v1927_v32 }
 0x249   : > { %v1307_v36 = vpop.f32.mrf.mxu1 }
 0x24a   : > { %1064 = vst [vmem:[%s1932_s14 + $0x80] sm:$0xff] %v986_v35  ;;  %v1308_v37 = vadd.f32 %v1307_v36, %v1306_v56 }
 0x24b   : > { %v1309_v38 = vpop.f32.mrf.mxu1 }
 0x24c   : > { %v989_v39 = vadd.f32 %v1308_v37, %v1927_v32 }
 0x24d   : > { %v1310_v40 = vpop.f32.mrf.mxu1 }
 0x24e   : > { %1065 = vst [vmem:[%s1932_s14 + $0x88] sm:$0xff] %v989_v39  ;;  %v1311_v41 = vadd.f32 %v1310_v40, %v1309_v38 }
 0x24f   : > { %v1312_v42 = vpop.f32.mrf.mxu1 }
 0x250   : > { %v994_v43 = vadd.f32 %v1311_v41, %v1927_v32 }
 0x251   : > { %v1313_v44 = vpop.f32.mrf.mxu1 }
 0x252   : > { %1066 = vst [vmem:[%s1932_s14 + $0x90] sm:$0xff] %v994_v43  ;;  %v1314_v45 = vadd.f32 %v1313_v44, %v1312_v42 }
 0x253   : > { %v1315_v46 = vpop.f32.mrf.mxu1 }
 0x254   : > { %v997_v47 = vadd.f32 %v1314_v45, %v1927_v32 }
 0x255   : > { %v1316_v48 = vpop.f32.mrf.mxu1 }
 0x256   : > { %1067 = vst [vmem:[%s1932_s14 + $0x98] sm:$0xff] %v997_v47  ;;  %v1317_v49 = vadd.f32 %v1316_v48, %v1315_v46 }
 0x257   : > { %v1318_v50 = vpop.f32.mrf.mxu1 }
 0x258   : > { %v1002_v51 = vadd.f32 %v1317_v49, %v1927_v32 }
 0x259   : > { %v1319_v52 = vpop.f32.mrf.mxu1 }
 0x25a   : > { %1068 = vst [vmem:[%s1932_s14 + $0xa0] sm:$0xff] %v1002_v51  ;;  %v1320_v53 = vadd.f32 %v1319_v52, %v1318_v50 }
 0x25b   : > { %v1321_v54 = vpop.f32.mrf.mxu1 }
 0x25c   : > { %v1005_v55 = vadd.f32 %v1320_v53, %v1927_v32 }
 0x25d   : > { %v1322_v58 = vpop.f32.mrf.mxu1 }
 0x25e   : > { %1069 = vst [vmem:[%s1932_s14 + $0xa8] sm:$0xff] %v1005_v55  ;;  %v1323_v59 = vadd.f32 %v1322_v58, %v1321_v54 }
 0x25f   : > { %v1324_v60 = vpop.f32.mrf.mxu1 }
 0x260   : > { %v1010_v0 = vadd.f32 %v1323_v59, %v1927_v32 }
 0x261   : > { %v1325_v61 = vpop.f32.mrf.mxu1 }
 0x262   : > { %1070 = vst [vmem:[%s1932_s14 + $0xb0] sm:$0xff] %v1010_v0  ;;  %v1326_v62 = vadd.f32 %v1325_v61, %v1324_v60 }
 0x263   : > { %v1327_v63 = vpop.f32.mrf.mxu1 }
 0x264   : > { %v1013_v1 = vadd.f32 %v1326_v62, %v1927_v32 }
 0x265   : > { %v1328_v2 = vpop.f32.mrf.mxu1 }
 0x266   : > { %1071 = vst [vmem:[%s1932_s14 + $0xb8] sm:$0xff] %v1013_v1  ;;  %v1329_v3 = vadd.f32 %v1328_v2, %v1327_v63 }
 0x267   : > { %v1330_v4 = vpop.f32.mrf.mxu1 }
 0x268   : > { %v1018_v5 = vadd.f32 %v1329_v3, %v1927_v32 }
 0x269   : > { %v1331_v6 = vpop.f32.mrf.mxu1 }
 0x26a   : > { %1072 = vst [vmem:[%s1932_s14 + $0xc0] sm:$0xff] %v1018_v5  ;;  %v1332_v7 = vadd.f32 %v1331_v6, %v1330_v4 }
 0x26b   : > { %v1333_v8 = vpop.f32.mrf.mxu1 }
 0x26c   : > { %v1021_v9 = vadd.f32 %v1332_v7, %v1927_v32 }
 0x26d   : > { %v1334_v10 = vpop.f32.mrf.mxu1 }
 0x26e   : > { %1073 = vst [vmem:[%s1932_s14 + $0xc8] sm:$0xff] %v1021_v9  ;;  %v1335_v11 = vadd.f32 %v1334_v10, %v1333_v8 }
 0x26f   : > { %v1336_v12 = vpop.f32.mrf.mxu1 }
 0x270   : > { %v1026_v13 = vadd.f32 %v1335_v11, %v1927_v32 }
 0x271   : > { %v1337_v14 = vpop.f32.mrf.mxu1 }
 0x272   : > { %1074 = vst [vmem:[%s1932_s14 + $0xd0] sm:$0xff] %v1026_v13  ;;  %v1338_v15 = vadd.f32 %v1337_v14, %v1336_v12 }
 0x273   : > { %v1339_v16 = vpop.f32.mrf.mxu1 }
 0x274   : > { %v1029_v17 = vadd.f32 %v1338_v15, %v1927_v32 }
 0x275   : > { %v1340_v18 = vpop.f32.mrf.mxu1 }
 0x276   : > { %1075 = vst [vmem:[%s1932_s14 + $0xd8] sm:$0xff] %v1029_v17  ;;  %v1341_v19 = vadd.f32 %v1340_v18, %v1339_v16 }
 0x277   : > { %v1342_v20 = vpop.f32.mrf.mxu1 }
 0x278   : > { %v1034_v21 = vadd.f32 %v1341_v19, %v1927_v32 }
 0x279   : > { %v1343_v22 = vpop.f32.mrf.mxu1 }
 0x27a   : > { %1076 = vst [vmem:[%s1932_s14 + $0xe0] sm:$0xff] %v1034_v21  ;;  %v1344_v23 = vadd.f32 %v1343_v22, %v1342_v20 }
 0x27b   : > { %v1345_v24 = vpop.f32.mrf.mxu1 }
 0x27c   : > { %v1037_v25 = vadd.f32 %v1344_v23, %v1927_v32 }
 0x27d   : > { %v1346_v26 = vpop.f32.mrf.mxu1 }
 0x27e   : > { %1077 = vst [vmem:[%s1932_s14 + $0xe8] sm:$0xff] %v1037_v25  ;;  %v1347_v27 = vadd.f32 %v1346_v26, %v1345_v24 }
 0x27f   : > { %v1348_v28 = vpop.f32.mrf.mxu1 }
 0x280   : > { %v1042_v29 = vadd.f32 %v1347_v27, %v1927_v32 }
 0x281   : > { %v1349_v30 = vpop.f32.mrf.mxu1 }
 0x282   : > { %1078 = vst [vmem:[%s1932_s14 + $0xf0] sm:$0xff] %v1042_v29  ;;  %v1350_v31 = vadd.f32 %v1349_v30, %v1348_v28 }
 0x284   : > { %v1045_v57 = vadd.f32 %v1350_v31, %v1927_v32 }
 0x286   : > { %1079 = vst [vmem:[%s1932_s14 + $0xf8] sm:$0xff] %v1045_v57 }
 0x287   : > { %1558 = shalt.err (!%p1555_p3)
}
 0x288   : > { %s1559_s15 = scalar_lea.hbm %s2000_s13, 4096  ;;  %s1563_s9 = scalar_lea.hbm %s2052_s5, 8192 }
 0x289   : > { %p1560_p11 = scmp.ne.s32.totalorder %s2000_s13, %s1559_s15  ;;  %p1564_p4 = scmp.lt.s32.totalorder %s2000_s13, %s2052_s5 }
 0x28a   : > { %p1565_p6 = scmp.lt.s32.totalorder %s1563_s9, %s1559_s15 }
 0x28b   : > { %p1561_p9 = pnand %p1560_p11, %p2069_p2 }
 0x28c   : > { %p1566_p8 = por %p1565_p6, %p1564_p4 }
 0x28d   : > { %p1562_p1 = pneg %p1561_p9 }
 0x28f   : > { %p1567_p10 = pnand %p1566_p8, %p1562_p1 }
 0x291   : > { %1570 = shalt.err (!%p1567_p10)
}
 0x292   : > { %s1624_s16 = smov 128   ;;  %s1625_s11 = smov 8  }
 0x293   : > { %1361 = dma.vmem_to_hbm [thread:$0]  (%p2069_p2), %s2002_s10, 4096, %s2000_s13, %s1081_s27, %s1624_s16, %s1624_s16, %s1625_s11  }
 0x294 PF: > { %s1109_s29 = sand.u32 1, %s1601_s18   ;;  %p2070_p7 = scmp.ne.s32.totalorder %s2059_s25, 0 }
 0x295   : > { %p2071_p12 = scmp.ge.s32.totalorder %s1613_s21, 2  ;;  %s1110_s23 = scalar_lea.sflag [#allocation4], %s1109_s29 }
 0x297   : > { %p1375_p13 = pnand %p2071_p12, %p2070_p7 }
 0x299   : > { %p1376_p0 = pneg %p1375_p13 }
 0x29b   : > { %1596 = dma.done.wait (%p1376_p0), %s1110_s23, 4096  }
 0x29c   : > { %1598 = vsyncadd (%p1376_p0), %s1110_s23, 4294963200  ;;  %p19_p5 = scmp.ge.s32.totalorder %s1731_s17, 4   ;;  %s2072_s18 = smov %s1605_s19 }
 0x29d   : > { %s2073_s19 = smov %s1609_s20  ;;  %s2074_s20 = smov %s1740_s28 }
 0x29e   : > { %s2075_s21 = smov %s1731_s17  ;;  %21 = sbr.rel (!%p19_p5) target bundleno = 6 (0x6), region = 93 }
 0x2a3   :  { %1115 = vsyncpa [#allocation3], 1 }
 0x2a4   :  { %1117 = vsyncpa [#allocation3 + $0x1], 1 }
 0x2a5   :  { %1118 = vsyncpa [#allocation6], 1 }
 0x2a6   :  { %1119 = vsyncpa [#allocation4], 1 }
 0x2a7   :  { %1121 = vsyncpa [#allocation4 + $0x1], 1 }

</bundles_post_ra>
